<compile_context>
chip_gen: v7x
topology: tpu7x:2x2x1
jax: 0.10.0
libtpu: 0.0.40
codegen_flags: <defaults>
</compile_context>

<pallas_src>
import jax
import jax.numpy as jnp
from jax.experimental import pallas as pl
from jax.experimental.pallas import tpu as pltpu

_TILE_BYTES = 4 * 1024 * 1024        # ~4 MiB per tile on the aligned path
_TAIL_BLOCK_BYTES = 512 * 1024       # per-tile bytes on the (1, n) fallback path


def _round_up(x, m):
    return (x + m - 1) // m * m


def _rehu_kernel(params_ref, x_ref, o_ref):
    half_alpha = params_ref[0]              # alpha / 2   (precomputed, SMEM)
    beta = params_ref[1]                    # -softplus(d) / 2

    x = x_ref[...].astype(jnp.float32)      # upcast in-register (no-op for f32)
    quad = half_alpha * x * jnp.abs(x)      # == sign(x) * (alpha/2) * x^2
    clamped = jnp.clip(quad, 0.0, -beta)
    o_ref[...] = jnp.maximum(clamped, x + beta).astype(o_ref.dtype)


def rehu(x, d):
    """Apply ReHU elementwise. x: any float array, d: scalar parameter."""
    orig_shape = x.shape
    orig_dtype = x.dtype

    # Keep sub-32-bit floats narrow in HBM; everything else goes through f32.
    if orig_dtype in (jnp.float32, jnp.bfloat16, jnp.float16):
        io_dtype = orig_dtype
    else:
        io_dtype = jnp.float32              # TODO(synk): f64 computed in f32.
    itemsize = jnp.dtype(io_dtype).itemsize
    sublane = 16 if itemsize == 2 else 8    # packed tile is (16,128) for 16-bit

    flat = x.reshape(-1)
    if flat.dtype != io_dtype:
        flat = flat.astype(io_dtype)
    n = flat.shape[0]

    # Hoist the scalar parameter math out of the kernel.
    sp = jnp.logaddexp(jnp.asarray(d, jnp.float32), 0.0)      # softplus(d)
    params = jnp.stack([0.5 / sp, -sp / 2.0]).astype(jnp.float32)

    cost = pl.CostEstimate(flops=6 * n, transcendentals=0,
                           bytes_accessed=2 * n * itemsize)
    cparams = pltpu.CompilerParams(
        dimension_semantics=("parallel",),
        vmem_limit_bytes=32 * 1024 * 1024)

    # Widest lane-dense factorization that needs no pad copy.
    lanes = None
    for cand in (1024, 512, 256, 128):
        if n % cand == 0:
            lanes = cand
            break

    if lanes is not None:
        # Aligned path: (rows, lanes) slab, metadata-only reshape.
        rows = n // lanes
        x2d = flat.reshape(rows, lanes)
        target_rows = max(sublane,
                          (_TILE_BYTES // (lanes * itemsize)) // sublane * sublane)
        if target_rows >= rows:
            if rows >= 2 * sublane:
                # Split so the grid has >= 2 steps (v7x: both TensorCores busy).
                block_rows = _round_up(pl.cdiv(rows, 2), sublane)
            else:
                block_rows = rows            # full-dim block is always legal
        else:
            block_rows = target_rows
        grid = (pl.cdiv(rows, block_rows),)  # partial last block is masked
        blockspec = pl.BlockSpec((block_rows, lanes), lambda i: (i, 0))
        out2d_shape = (rows, lanes)
    else:
        # Misaligned path: (1, n) lane-dense view; Pallas masks the partial
        # tail block, so no pad and no trailing slice copy.
        x2d = flat.reshape(1, n)
        cap = _TAIL_BLOCK_BYTES // itemsize  # multiple of 128 for 2/4-byte dtypes
        if n <= 256:
            block_lanes = n                  # full-dim block, always legal
        elif n <= 2 * cap:
            block_lanes = min(_round_up(pl.cdiv(n, 2), 128), cap)  # grid >= 2
        else:
            block_lanes = cap
        grid = (pl.cdiv(n, block_lanes),)
        blockspec = pl.BlockSpec((1, block_lanes), lambda i: (0, i))
        out2d_shape = (1, n)

    out2d = pl.pallas_call(
        _rehu_kernel,
        out_shape=jax.ShapeDtypeStruct(out2d_shape, io_dtype),
        grid=grid,
        in_specs=[
            pl.BlockSpec(memory_space=pltpu.SMEM),   # (2,) scalar params
            blockspec,                                # x tile
        ],
        out_specs=blockspec,
        compiler_params=cparams,
        cost_estimate=cost,
    )(params, x2d)

    return out2d.reshape(orig_shape).astype(orig_dtype)


def rehu_ref(x, d):
    """Pure-JAX reference mirroring the PyTorch forward."""
    xf = x.astype(jnp.float32)
    sp = jnp.logaddexp(jnp.asarray(d, jnp.float32), 0.0)
    alpha = 1.0 / sp
    beta = -sp / 2.0
    quad = jnp.sign(xf) * (alpha / 2.0) * xf ** 2
    return jnp.maximum(jnp.clip(quad, 0.0, -beta), xf + beta).astype(x.dtype)


if __name__ == "__main__":
    root = jax.random.PRNGKey(0)
    k0, k1, k2, k3 = jax.random.split(root, 4)
    d = jnp.float32(1.0)  # deterministic init of the nn.Parameter (d=1.0)

    # NCHW input, as produced upstream of this activation in the PyTorch model.
    x = jax.random.normal(k0, (2, 4, 16, 16), dtype=jnp.float32) * 2.0
    out = jax.block_until_ready(rehu(x, d))
    assert out.shape == x.shape and out.dtype == x.dtype
    assert jnp.allclose(out, rehu_ref(x, d), atol=1e-6, rtol=1e-6)

    # Odd, non-128-divisible size exercises the masked (1, n) path (no pad copy).
    x2 = jax.random.normal(k1, (3, 5, 7, 11), dtype=jnp.float32)
    out2 = jax.block_until_ready(rehu(x2, d))
    assert jnp.allclose(out2, rehu_ref(x2, d), atol=1e-6, rtol=1e-6)

    # bf16 stays bf16 in HBM; math in f32 in-register.
    x3 = jax.random.normal(k2, (2, 4, 16, 16), dtype=jnp.bfloat16)
    out3 = jax.block_until_ready(rehu(x3, d))
    assert out3.dtype == jnp.bfloat16
    assert jnp.allclose(out3.astype(jnp.float32),
                        rehu_ref(x3, d).astype(jnp.float32), atol=2e-2, rtol=2e-2)

    # f16 also stays narrow in HBM now.
    x4 = jax.random.normal(k3, (2, 4, 16, 16), dtype=jnp.float16)
    out4 = jax.block_until_ready(rehu(x4, d))
    assert out4.dtype == jnp.float16
    assert jnp.allclose(out4.astype(jnp.float32),
                        rehu_ref(x4, d).astype(jnp.float32), atol=2e-2, rtol=2e-2)

    print("KERNEL_OK")
</pallas_src>

<mosaic_0001>
module attributes {stable_mosaic.version = 11 : i64} {
  func.func @_rehu_kernel(%arg0: i32, %arg1: memref<2xf32, #tpu.memory_space<smem>>, %arg2: memref<2x1024xf32, #tpu.memory_space<vmem>>, %arg3: memref<2x1024xf32, #tpu.memory_space<vmem>>) attributes {dimension_semantics = [#tpu.dimension_semantics<parallel>], iteration_bounds = array<i64: 1>, scalar_prefetch = 0 : i64, scratch_operands = 0 : i64, tpu.core_type = #tpu.core_type<tc>, window_params = [{transform_indices = @transform_0, window_bounds = array<i64: 2>}, {transform_indices = @transform_1, window_bounds = array<i64: 2, 1024>}, {transform_indices = @transform_2, window_bounds = array<i64: 2, 1024>}]} {
    %c0 = arith.constant 0 : index
    %0 = memref.load %arg1[%c0] : memref<2xf32, #tpu.memory_space<smem>>
    %c1 = arith.constant 1 : index
    %1 = memref.load %arg1[%c1] : memref<2xf32, #tpu.memory_space<smem>>
    %c0_0 = arith.constant 0 : index
    %c0_1 = arith.constant 0 : index
    %2 = vector.load %arg2[%c0_0, %c0_1] : memref<2x1024xf32, #tpu.memory_space<vmem>>, vector<2x1024xf32>
    %3 = vector.broadcast %0 : f32 to vector<2x1024xf32>
    %4 = arith.mulf %3, %2 : vector<2x1024xf32>
    %5 = math.absf %2 : vector<2x1024xf32>
    %6 = arith.mulf %4, %5 : vector<2x1024xf32>
    %cst = arith.constant 0.000000e+00 : f32
    %7 = arith.subf %cst, %1 : f32
    %cst_2 = arith.constant 0.000000e+00 : f32
    %8 = vector.broadcast %cst_2 : f32 to vector<2x1024xf32>
    %9 = arith.maximumf %8, %6 : vector<2x1024xf32>
    %10 = vector.broadcast %7 : f32 to vector<2x1024xf32>
    %11 = arith.minimumf %10, %9 : vector<2x1024xf32>
    %12 = vector.broadcast %1 : f32 to vector<2x1024xf32>
    %13 = arith.addf %2, %12 : vector<2x1024xf32>
    %14 = arith.maximumf %11, %13 : vector<2x1024xf32>
    %c0_3 = arith.constant 0 : index
    %c0_4 = arith.constant 0 : index
    %15 = vector.load %arg3[%c0_3, %c0_4] : memref<2x1024xf32, #tpu.memory_space<vmem>>, vector<2x1024xf32>
    tpu.vector_store %arg3[%c0_3, %c0_4], %14 {strides = array<i32>} : memref<2x1024xf32, #tpu.memory_space<vmem>>, vector<2x1024xf32>,
    return
  }
  func.func @transform_0(%arg0: i32) -> i32 {
    %c0_i32 = arith.constant 0 : i32
    %c0_i32_0 = arith.constant 0 : i32
    return %c0_i32 : i32
  }
  func.func @transform_1(%arg0: i32) -> (i32, i32) {
    %c0_i32 = arith.constant 0 : i32
    %c0_i32_0 = arith.constant 0 : i32
    return %arg0, %c0_i32 : i32, i32
  }
  func.func @transform_2(%arg0: i32) -> (i32, i32) {
    %c0_i32 = arith.constant 0 : i32
    %c0_i32_0 = arith.constant 0 : i32
    return %arg0, %c0_i32 : i32, i32
  }
}

</mosaic_0001>

<bundles_post_ra>
// kernel: tpu_custom_call.1
= control target key start
LH: loop header
LB: loop body
LE: loop exit
PB: predicated region body
PF: predicated region fallthrough
CT: control target
= control target key end

     0   :  { %7 = vsyncpa [#allocation5], 0  ;;  %s193_s0 = inlined_call_operand.hbm [shape: f32[2], index: 0, kind: input, shape index: {}]   ;;  %s194_s1 = inlined_call_operand.hbm [shape: f32[2,1024], index: 1, kind: input, shape index: {}]   ;;  %s195_s2 = inlined_call_operand.hbm [shape: f32[2,1024], index: 2, kind: output, shape index: {}]  }
   0x1   :  { %8 = vsyncpa [#allocation3], 0 }
   0x2   :  { %9 = vsyncpa [#allocation4], 0  ;;  %s79_s11 = scalar_lea.hbm %s193_s0, 16 }
   0x3   :  { %p80_p0 = scmp.ne.s32.totalorder %s193_s0, %s79_s11  ;;  %p83_p1 = scmp.lt.u32.totalorder %s79_s11, %s193_s0 }
   0x5   :  { %p85_p2 = pnand %p83_p1, %p80_p0 }
   0x7   :  { %88 = shalt.err (!%p85_p2)
}
   0x8   :  { %s139_s16 = smov [#allocation2]   ;;  %s140_s19 = smov [#allocation6]  }
   0x9   :  { %17 = dma.hbm_to_smem %s193_s0, 16, %s139_s16, [#allocation5]  }
   0xa   :  { %s24_s20 = sshll.u32 %s140_s19, 4  ;;  %s89_s23 = scalar_lea.hbm %s194_s1, 256  ;;  %s25_s20 = int_to_ptr.vmem [resolvable:$true] %s24_s20 }
   0xb   :  { %p90_p3 = scmp.ne.s32.totalorder %s194_s1, %s89_s23  ;;  %p93_p4 = scmp.lt.u32.totalorder %s89_s23, %s194_s1 }
   0xd   :  { %p95_p5 = pnand %p93_p4, %p90_p3 }
   0xf   :  { %98 = shalt.err (!%p95_p5)
}
  0x10   :  { %s99_s28 = scalar_lea.vmem %s25_s20, 256  ;;  %p104_p7 = scmp.lt.s32.totalorder %s25_s20, %s25_s20 }
  0x11   :  { %p100_p6 = scmp.ne.s32.totalorder %s25_s20, %s99_s28  ;;  %p105_p8 = scmp.lt.s32.totalorder %s99_s28, %s99_s28 }
  0x13   :  { %p106_p9 = por %p105_p8, %p104_p7 }
  0x15   :  { %p107_p10 = pnand %p106_p9, %p100_p6 }
  0x17   :  { %110 = shalt.err (!%p107_p10)
}
  0x18   :  { %27 = dma.hbm_to_vmem [thread:$0]  %s194_s1, 256, %s25_s20, [#allocation3]  }
  0x19   :  { %133 = dma.done.wait [#allocation5], 16  }
  0x1a   :  { %134 = vsyncadd [#allocation5], 4294967280 }
  0x1b   :  { %135 = dma.done.wait [#allocation3], 256  }
  0x1c   :  { %136 = vsyncadd [#allocation3], 4294967040 }
  0x1d   :  { %34 = sfence }
  0x1e   :  { %s35_s30 = sld [smem:[#allocation2]]  ;;  %s75_s3 = sld [smem:[#allocation2 + $0x1]]  ;;  %v37_v0 = vld [vmem:[#allocation6] sm:$0xff]  ;;  %v38_v1 = vld [vmem:[#allocation6 + $0x8] sm:$0xff] }
  0x1f   :  { %v42_v2 = vand.u32 2147483647, %v37_v0  ;;  %v43_v3 = vand.u32 2147483647, %v38_v1  ;;  %s141_s1 = smov [#allocation7]  }
  0x20   :  { %s65_s5 = sshll.u32 %s141_s1, 4  ;;  %s66_s5 = int_to_ptr.vmem [resolvable:$true] %s65_s5 }
  0x21   :  { %s111_s6 = scalar_lea.vmem %s66_s5, 256  ;;  %p116_p12 = scmp.lt.s32.totalorder %s66_s5, %s66_s5 }
  0x22   :  { %p112_p11 = scmp.ne.s32.totalorder %s66_s5, %s111_s6  ;;  %p117_p13 = scmp.lt.s32.totalorder %s111_s6, %s111_s6 }
  0x24   :  { %v39_v4 = vstv %s35_s30  ;;  %s46_s4 = ssub.f32 0.0, %s75_s3  ;;  %v52_v7 = vstv %s75_s3  ;;  %p118_p0 = por %p117_p13, %p116_p12 }
  0x25   :  { %v40_v5 = vmul.f32 %v39_v4, %v37_v0  ;;  %v41_v6 = vmul.f32 %v39_v4, %v38_v1  ;;  %v53_v12 = vadd.f32 %v52_v7, %v37_v0  ;;  %v54_v14 = vadd.f32 %v52_v7, %v38_v1 }
  0x26   :  { %v49_v10 = vstv %s46_s4  ;;  %p119_p1 = pnand %p118_p0, %p112_p11 }
  0x27   :  { %v44_v8 = vmul.f32 %v42_v2, %v40_v5  ;;  %v45_v9 = vmul.f32 %v43_v3, %v41_v6 }
  0x29   :  { %v47_v11 = vmax.f32 %v44_v8, 0.0  ;;  %v48_v13 = vmax.f32 %v45_v9, 0.0 }
  0x2b   :  { %v50_v15 = vmin.f32 %v49_v10, %v47_v11  ;;  %v51_v16 = vmin.f32 %v49_v10, %v48_v13 }
  0x2d   :  { %v55_v17 = vmax.f32 %v50_v15, %v53_v12  ;;  %v56_v18 = vmax.f32 %v51_v16, %v54_v14 }
  0x2f   :  { %57 = vst [vmem:[#allocation7] sm:$0xff] %v55_v17  ;;  %58 = vst [vmem:[#allocation7 + $0x8] sm:$0xff] %v56_v18 }
  0x30   :  { %122 = shalt.err (!%p119_p1)
}
  0x31   :  { %s123_s9 = scalar_lea.hbm %s195_s2, 256 }
  0x32   :  { %p124_p2 = scmp.ne.s32.totalorder %s195_s2, %s123_s9  ;;  %p127_p3 = scmp.lt.u32.totalorder %s123_s9, %s195_s2 }
  0x34   :  { %p129_p4 = pnand %p127_p3, %p124_p2 }
  0x36   :  { %132 = shalt.err (!%p129_p4)
}
  0x37   :  { %68 = dma.vmem_to_hbm [thread:$0]  %s66_s5, 256, %s195_s2, [#allocation4]  }
  0x38   :  { %137 = dma.done.wait [#allocation4], 256  }
  0x39   :  { %138 = vsyncadd [#allocation4], 4294967040 }
  0x3a   :  { %72 = vsyncpa [#allocation3], 1 }
  0x3b   :  { %73 = vsyncpa [#allocation4], 1 }
  0x3c   :  { %74 = vsyncpa [#allocation5], 1 }

</bundles_post_ra>
